<compile_context>
chip_gen: v7x
topology: tpu7x:2x2x1
jax: 0.10.0
libtpu: 0.0.40
codegen_flags: <defaults>
</compile_context>

<pallas_src>
import functools

import jax
import jax.numpy as jnp
from jax.experimental import pallas as pl
from jax.experimental.pallas import tpu as pltpu


# --------------------------------------------------------------------------
# Fused kernel: represent layers -> hidden2out -> sigmoid -> BCE (mean)
# --------------------------------------------------------------------------
def discriminator_kernel(hidden_ref, w_rep_ref, b_rep_ref, w_out_ref, b_out_ref,
                         target_ref, p_ref, loss_ref, *, clf_layers):
    h = hidden_ref[...]                                    # (B, H) f32

    # represent_layer_list: plain Linear(H,H) stack (no nonlinearity in the module)
    for l in range(clf_layers):                            # static unroll, L is tiny
        h = jnp.dot(h, w_rep_ref[l],
                    preferred_element_type=jnp.float32) + b_rep_ref[l]

    # hidden2out as a lane-dense VPU multiply + cross-lane reduce instead of a
    # (B,H)@(H,1) MXU matmul with a 1-lane output.
    logits = jnp.sum(h * w_out_ref[...], axis=-1, keepdims=True) + b_out_ref[0, 0]
    p = jax.nn.sigmoid(logits)                             # (B, 1)
    p_ref[...] = p

    # torch.nn.BCELoss (mean reduction, logs clamped at -100)
    y = target_ref[...]                                    # (B, 1)
    logp = jnp.maximum(jnp.log(p), -100.0)
    log1mp = jnp.maximum(jnp.log1p(-p), -100.0)
    bce = -(y * logp + (1.0 - y) * log1mp)
    loss_ref[0, 0] = jnp.mean(bce)                         # scalar -> SMEM


def discriminator_forward_bce(params, hidden, target):
    """Returns (mean BCE loss, sigmoid probabilities (B,1))."""
    B, H = hidden.shape
    L = params["w_rep"].shape[0]

    kernel = functools.partial(discriminator_kernel, clf_layers=L)
    p, loss = pl.pallas_call(
        kernel,
        out_shape=(
            jax.ShapeDtypeStruct((B, 1), jnp.float32),     # probabilities
            jax.ShapeDtypeStruct((1, 1), jnp.float32),     # scalar loss
        ),
        in_specs=[
            pl.BlockSpec(memory_space=pltpu.MemorySpace.VMEM),   # hidden   (B, H)
            pl.BlockSpec(memory_space=pltpu.MemorySpace.VMEM),   # w_rep    (L, H, H)
            pl.BlockSpec(memory_space=pltpu.MemorySpace.VMEM),   # b_rep    (L, 1, H)
            pl.BlockSpec(memory_space=pltpu.MemorySpace.VMEM),   # w_out    (1, H)
            pl.BlockSpec(memory_space=pltpu.MemorySpace.SMEM),   # b_out    (1, 1) scalar
            pl.BlockSpec(memory_space=pltpu.MemorySpace.VMEM),   # target   (B, 1)
        ],
        out_specs=(
            pl.BlockSpec(memory_space=pltpu.MemorySpace.VMEM),   # p        (B, 1)
            pl.BlockSpec(memory_space=pltpu.MemorySpace.SMEM),   # loss     (1, 1) scalar
        ),
    )(hidden, params["w_rep"], params["b_rep"], params["w_out_row"],
      params["b_out"], target)
    return loss[0, 0], p


def discriminator_batch_bce(params, in_hidden, target):
    """Mirror of Discriminator.batchBCELoss: (loss, {'y_pre', 'y_true'})."""
    loss, p = discriminator_forward_bce(params, in_hidden, target)
    y_pre = jnp.where(p > 0.5, jnp.ones_like(p), jnp.zeros_like(p))
    return loss, {"y_pre": y_pre, "y_true": target}


# --------------------------------------------------------------------------
# Pure-JAX reference (for a sanity check at toy sizes)
# --------------------------------------------------------------------------
def discriminator_reference(params, hidden, target):
    h = hidden
    for l in range(params["w_rep"].shape[0]):
        h = jnp.dot(h, params["w_rep"][l],
                    precision=jax.lax.Precision.HIGHEST) + params["b_rep"][l]
    logits = jnp.sum(h * params["w_out_row"], axis=-1, keepdims=True) + params["b_out"][0, 0]
    p = jax.nn.sigmoid(logits)
    logp = jnp.maximum(jnp.log(p), -100.0)
    log1mp = jnp.maximum(jnp.log1p(-p), -100.0)
    loss = jnp.mean(-(target * logp + (1.0 - target) * log1mp))
    return loss, p


if __name__ == "__main__":
    B, H, L = 8, 32, 2          # batch (sublane-aligned), hidden_dim, clf_layers

    key = jax.random.PRNGKey(0)
    k_h, k_t, k_wr, k_br, k_wo, k_bo = jax.random.split(key, 6)

    hidden = jax.random.normal(k_h, (B, H), jnp.float32)
    target = jax.random.bernoulli(k_t, 0.5, (B, 1)).astype(jnp.float32)

    scale = 0.1
    params = {
        "w_rep":     scale * jax.random.normal(k_wr, (L, H, H), jnp.float32),
        "b_rep":     scale * jax.random.normal(k_br, (L, 1, H), jnp.float32),
        "w_out_row": scale * jax.random.normal(k_wo, (1, H), jnp.float32),
        "b_out":     scale * jax.random.normal(k_bo, (1, 1), jnp.float32),
    }

    loss, aux = discriminator_batch_bce(params, hidden, target)
    jax.block_until_ready((loss, aux))

    # shape checks + numerical sanity check against the pure-JAX reference
    assert loss.shape == ()
    assert aux["y_pre"].shape == (B, 1)
    assert aux["y_true"].shape == (B, 1)

    ref_loss, ref_p = discriminator_reference(params, hidden, target)
    assert jnp.allclose(loss, ref_loss, atol=1e-4, rtol=1e-4)

    print("KERNEL_OK")
</pallas_src>

<mosaic_0001>
module attributes {stable_mosaic.version = 11 : i64} {
  func.func @discriminator_kernel(%arg0: memref<8x32xf32, #tpu.memory_space<vmem>>, %arg1: memref<2x32x32xf32, #tpu.memory_space<vmem>>, %arg2: memref<2x1x32xf32, #tpu.memory_space<vmem>>, %arg3: memref<1x32xf32, #tpu.memory_space<vmem>>, %arg4: memref<1x1xf32, #tpu.memory_space<smem>>, %arg5: memref<8x1xf32, #tpu.memory_space<vmem>>, %arg6: memref<8x1xf32, #tpu.memory_space<vmem>>, %arg7: memref<1x1xf32, #tpu.memory_space<smem>>) attributes {dimension_semantics = [], scalar_prefetch = 0 : i64, scratch_operands = 0 : i64, tpu.core_type = #tpu.core_type<tc>} {
    %c0 = arith.constant 0 : index
    %c0_0 = arith.constant 0 : index
    %0 = vector.load %arg0[%c0, %c0_0] : memref<8x32xf32, #tpu.memory_space<vmem>>, vector<8x32xf32>
    %c0_1 = arith.constant 0 : index
    %c0_2 = arith.constant 0 : index
    %c0_3 = arith.constant 0 : index
    %1 = vector.load %arg1[%c0_1, %c0_2, %c0_3] : memref<2x32x32xf32, #tpu.memory_space<vmem>>, vector<1x32x32xf32>
    %2 = vector.shape_cast %1 : vector<1x32x32xf32> to vector<32x32xf32>
    %cst = arith.constant dense<0.000000e+00> : vector<8x32xf32>
    %3 = tpu.matmul %0, %2, %cst {dimension_numbers = #tpu.dot_dimension_numbers<[1], [0], [0], [1], [0, 0, 1, 1], [], []>} : vector<8x32xf32>, vector<32x32xf32>, vector<8x32xf32> -> vector<8x32xf32>
    %c0_4 = arith.constant 0 : index
    %c0_5 = arith.constant 0 : index
    %c0_6 = arith.constant 0 : index
    %4 = vector.load %arg2[%c0_4, %c0_5, %c0_6] : memref<2x1x32xf32, #tpu.memory_space<vmem>>, vector<1x1x32xf32>
    %5 = vector.shape_cast %4 : vector<1x1x32xf32> to vector<1x32xf32>
    %6 = vector.broadcast %5 : vector<1x32xf32> to vector<8x32xf32>
    %7 = arith.addf %3, %6 : vector<8x32xf32>
    %c1 = arith.constant 1 : index
    %c0_7 = arith.constant 0 : index
    %c0_8 = arith.constant 0 : index
    %8 = vector.load %arg1[%c1, %c0_7, %c0_8] : memref<2x32x32xf32, #tpu.memory_space<vmem>>, vector<1x32x32xf32>
    %9 = vector.shape_cast %8 : vector<1x32x32xf32> to vector<32x32xf32>
    %cst_9 = arith.constant dense<0.000000e+00> : vector<8x32xf32>
    %10 = tpu.matmul %7, %9, %cst_9 {dimension_numbers = #tpu.dot_dimension_numbers<[1], [0], [0], [1], [0, 0, 1, 1], [], []>} : vector<8x32xf32>, vector<32x32xf32>, vector<8x32xf32> -> vector<8x32xf32>
    %c1_10 = arith.constant 1 : index
    %c0_11 = arith.constant 0 : index
    %c0_12 = arith.constant 0 : index
    %11 = vector.load %arg2[%c1_10, %c0_11, %c0_12] : memref<2x1x32xf32, #tpu.memory_space<vmem>>, vector<1x1x32xf32>
    %12 = vector.shape_cast %11 : vector<1x1x32xf32> to vector<1x32xf32>
    %13 = vector.broadcast %12 : vector<1x32xf32> to vector<8x32xf32>
    %14 = arith.addf %10, %13 : vector<8x32xf32>
    %c0_13 = arith.constant 0 : index
    %c0_14 = arith.constant 0 : index
    %15 = vector.load %arg3[%c0_13, %c0_14] : memref<1x32xf32, #tpu.memory_space<vmem>>, vector<1x32xf32>
    %16 = vector.broadcast %15 : vector<1x32xf32> to vector<8x32xf32>
    %17 = arith.mulf %14, %16 : vector<8x32xf32>
    %cst_15 = arith.constant dense<0.000000e+00> : vector<8xf32>
    %18 = vector.multi_reduction <add>, %17, %cst_15 [1] : vector<8x32xf32> to vector<8xf32>
    %19 = vector.shape_cast %18 : vector<8xf32> to vector<8x1xf32>
    %c0_16 = arith.constant 0 : index
    %c0_17 = arith.constant 0 : index
    %20 = memref.load %arg4[%c0_16, %c0_17] : memref<1x1xf32, #tpu.memory_space<smem>>
    %21 = vector.broadcast %20 : f32 to vector<8x1xf32>
    %22 = arith.addf %19, %21 : vector<8x1xf32>
    %23 = arith.negf %22 : vector<8x1xf32>
    %24 = math.exp %23 : vector<8x1xf32>
    %cst_18 = arith.constant 1.000000e+00 : f32
    %25 = vector.broadcast %cst_18 : f32 to vector<8x1xf32>
    %26 = arith.addf %25, %24 : vector<8x1xf32>
    %27 = arith.divf %25, %26 : vector<8x1xf32>
    %c0_19 = arith.constant 0 : index
    %c0_20 = arith.constant 0 : index
    %28 = vector.load %arg6[%c0_19, %c0_20] : memref<8x1xf32, #tpu.memory_space<vmem>>, vector<8x1xf32>
    tpu.vector_store %arg6[%c0_19, %c0_20], %27 {strides = array<i32>} : memref<8x1xf32, #tpu.memory_space<vmem>>, vector<8x1xf32>,
    %c0_21 = arith.constant 0 : index
    %c0_22 = arith.constant 0 : index
    %29 = vector.load %arg5[%c0_21, %c0_22] : memref<8x1xf32, #tpu.memory_space<vmem>>, vector<8x1xf32>
    %30 = math.log %27 : vector<8x1xf32>
    %cst_23 = arith.constant -1.000000e+02 : f32
    %31 = vector.broadcast %cst_23 : f32 to vector<8x1xf32>
    %32 = arith.maximumf %30, %31 : vector<8x1xf32>
    %cst_24 = arith.constant 0.000000e+00 : f32
    %33 = vector.broadcast %cst_24 : f32 to vector<8x1xf32>
    %34 = arith.subf %33, %27 : vector<8x1xf32>
    %35 = math.log1p %34 : vector<8x1xf32>
    %cst_25 = arith.constant -1.000000e+02 : f32
    %36 = vector.broadcast %cst_25 : f32 to vector<8x1xf32>
    %37 = arith.maximumf %35, %36 : vector<8x1xf32>
    %38 = arith.mulf %29, %32 : vector<8x1xf32>
    %cst_26 = arith.constant 1.000000e+00 : f32
    %39 = vector.broadcast %cst_26 : f32 to vector<8x1xf32>
    %40 = arith.subf %39, %29 : vector<8x1xf32>
    %41 = arith.mulf %40, %37 : vector<8x1xf32>
    %42 = arith.addf %38, %41 : vector<8x1xf32>
    %cst_27 = arith.constant 0.000000e+00 : f32
    %43 = vector.broadcast %cst_27 : f32 to vector<8x1xf32>
    %44 = arith.subf %43, %42 : vector<8x1xf32>
    %45 = vector.shape_cast %44 : vector<8x1xf32> to vector<1x8x1xf32>
    %cst_28 = arith.constant dense<0.000000e+00> : vector<1xf32>
    %46 = vector.multi_reduction <add>, %45, %cst_28 [1, 2] : vector<1x8x1xf32> to vector<1xf32>
    %47 = vector.shape_cast %46 : vector<1xf32> to vector<1x1x1xf32>
    %48 = vector.extract %47[0, 0, 0] : f32 from vector<1x1x1xf32>
    %cst_29 = arith.constant 8.000000e+00 : f32
    %49 = arith.divf %48, %cst_29 : f32
    %c0_30 = arith.constant 0 : index
    %c0_31 = arith.constant 0 : index
    %50 = memref.load %arg7[%c0_30, %c0_31] : memref<1x1xf32, #tpu.memory_space<smem>>
    memref.store %49, %arg7[%c0_30, %c0_31] : memref<1x1xf32, #tpu.memory_space<smem>>
    return
  }
}

</mosaic_0001>

<bundles_post_ra>
// kernel: tpu_custom_call.1
= control target key start
LH: loop header
LB: loop body
LE: loop exit
PB: predicated region body
PF: predicated region fallthrough
CT: control target
= control target key end

     0   :  { %14 = vsyncpa [#allocation4], 0  ;;  %s489_s0 = inlined_call_operand.vmem [shape: f32[8,32], index: 0, kind: input, shape index: {}]   ;;  %s490_s1 = inlined_call_operand.hbm [shape: f32[2,32,32], index: 1, kind: input, shape index: {}]   ;;  %s491_s2 = inlined_call_operand.vmem [shape: f32[2,1,32], index: 2, kind: input, shape index: {}]   ;;  %s492_s3 = inlined_call_operand.vmem [shape: f32[1,32], index: 3, kind: input, shape index: {}]   ;;  %s493_s4 = inlined_call_operand.<no memory space> [shape: f32[1,1], index: 4, kind: input, shape index: {}]   ;;  %s494_s5 = inlined_call_operand.vmem [shape: f32[8,1], index: 5, kind: input, shape index: {}]   ;;  %s495_s6 = inlined_call_operand.vmem [shape: f32[8,1], index: 6, kind: output, shape index: {0}]   ;;  %s496_s7 = inlined_call_operand.hbm [shape: f32[1,1], index: 7, kind: output, shape index: {1}]  }
   0x1   :  { %15 = vsyncpa [#allocation5], 0  ;;  %s392_s24 = smov [#allocation3]   ;;  %s356_s28 = scalar_lea.hbm %s490_s1, 1024 }
   0x2   :  { %s23_s25 = sshll.u32 %s392_s24, 4  ;;  %p357_p0 = scmp.ne.s32.totalorder %s490_s1, %s356_s28  ;;  %s24_s25 = int_to_ptr.vmem [resolvable:$true] %s23_s25 }
   0x3   :  { %p360_p1 = scmp.lt.u32.totalorder %s356_s28, %s490_s1 }
   0x5   :  { %p362_p2 = pnand %p360_p1, %p357_p0 }
   0x7   :  { %365 = shalt.err (!%p362_p2)
}
   0x8   :  { %s366_s10 = scalar_lea.vmem %s24_s25, 1024  ;;  %p371_p4 = scmp.lt.s32.totalorder %s24_s25, %s24_s25 }
   0x9   :  { %p367_p3 = scmp.ne.s32.totalorder %s24_s25, %s366_s10  ;;  %p372_p5 = scmp.lt.s32.totalorder %s366_s10, %s366_s10 }
   0xb   :  { %p373_p6 = por %p372_p5, %p371_p4 }
   0xd   :  { %p374_p7 = pnand %p373_p6, %p367_p3 }
   0xf   :  { %377 = shalt.err (!%p374_p7)
}
  0x10   :  { %s393_s11 = smov 128   ;;  %s394_s12 = smov 8  }
  0x11   :  { %29 = dma.hbm_to_vmem [thread:$0]  %s490_s1, 1024, %s24_s25, [#allocation4], %s393_s11, %s393_s11, %s394_s12  }
  0x12   :  { %388 = dma.done.wait [#allocation4], 1024  }
  0x13   :  { %389 = vsyncadd [#allocation4], 4294966272  ;;  %v395_v0 = vmov 0.0|0.0   ;;  %vm396_vm0 = vmmov 0   ;;  %v397_v1 = vmov 0.0   ;;  %v42_v2 = vld [vmem:[#allocation3] sm:$0xff]  ;;  %v225_v26 = vstv %s493_s4 }
  0x14   :  { %327 = vmatprep.subr.bf16.mxu0 %v395_v0  ;;  %313 = vmatprep.mubr.msk.f32.mxu0 %vm396_vm0, %v397_v1  ;;  %v43_v3 = vld [vmem:[#allocation3 + $0x8] sm:$0xff]  ;;  %v44_v4 = vld [vmem:[#allocation3 + $0x10] sm:$0xff]  ;;  %v45_v6 = vld [vmem:[#allocation3 + $0x18] sm:$0xff]  ;;  %vm53_vm1 = vcmask 261120   ;;  %vm233_vm2 = vcmask 7168   ;;  %s378_s26 = scalar_lea.hbm %s496_s7, 16 }
  0x15   :  { %333 = vmatprep.subr.bf16.mxu1 %v395_v0  ;;  %324 = vmatprep.mubr.msk.f32.mxu1 %vm396_vm0, %v397_v1  ;;  %v328_v5 = vpack.c.bf16 %v43_v3, %v42_v2  ;;  %v128_v7 = vld [vmem:[#allocation3 + $0x20] sm:$0xff]  ;;  %v129_v8 = vld [vmem:[#allocation3 + $0x28] sm:$0xff]  ;;  %v331_v9 = vpack.c.bf16 %v45_v6, %v44_v4  ;;  %v130_v12 = vld [vmem:[#allocation3 + $0x30] sm:$0xff]  ;;  %p379_p8 = scmp.ne.s32.totalorder %s496_s7, %s378_s26  ;;  %p382_p9 = scmp.lt.u32.totalorder %s378_s26, %s496_s7 }
  0x16   :  { %v334_v10 = vpack.c.bf16 %v129_v8, %v128_v7  ;;  %v41_v11 = vld [vmem:[%s489_s0] sm:$0xff]  ;;  %v131_v13 = vld [vmem:[#allocation3 + $0x38] sm:$0xff] }
  0x17   :  { %329 = vmatpush3.bf16.msra.mxu0 %v328_v5  ;;  %v337_v14 = vpack.c.bf16 %v131_v13, %v130_v12  ;;  %v288_v15 = vld [vmem:[%s491_s2] ss:$0 sm:$0xff]  ;;  %v291_v19 = vld [vmem:[%s491_s2 + $0x1] ss:$0 sm:$0xff]  ;;  %p384_p10 = pnand %p382_p9, %p379_p8 }
  0x18   :  { %330 = vmatprep.subr.bf16.mxu0 %v395_v0  ;;  %335 = vmatpush3.bf16.msra.mxu1 %v334_v10  ;;  %v293_v21 = vld [vmem:[%s492_s3] ss:$0 sm:$0xff] }
  0x19   :  { %336 = vmatprep.subr.bf16.mxu1 %v395_v0  ;;  %v235_v41 = vld [vmem:[%s494_s5] sm:$0xff] }
  0x1a   :  { %v251_v45 = vsub.f32 1.0, %v235_v41 }
  0x1b   :  { %332 = vmatpush3.bf16.msra.mxu0 %v331_v9 }
  0x1c   :  { %338 = vmatpush3.bf16.msra.mxu1 %v337_v14 }
  0x1e   :  { %314 = vmatmul.mubr.msk.f32.vlgmr.msra.gmra.mrb[0].mxu0 %vm53_vm1, %v41_v11 }
  0xf1   :  { %v123_v16 = vpop.f32.mrb[0].mxu0 }
  0xf2   :  { %v124_v17 = vadd.f32 %v288_v15, %v123_v16  ;;  %v315_v18 = vpop.f32.mrb[1].mxu0 }
  0xf4   :  { %325 = vmatmul.mubr.msk.f32.vlgmr.msra.gmra.mrb[0].mxu1 %vm53_vm1, %v124_v17 }
 0x1c7   :  { %v209_v20 = vpop.f32.mrb[0].mxu1 }
 0x1c8   :  { %v210_v22 = vadd.f32 %v291_v19, %v209_v20  ;;  %v326_v23 = vpop.f32.mrb[1].mxu1 }
 0x1ca   :  { %v220_v24 = vmul.f32 %v293_v21, %v210_v22 }
 0x1cc   :  { %v221_v25 = vsel %vm53_vm1, %v220_v24, 0.0 }
 0x1cd   :  { %222 = vadd.xlane.f32.xlu0 %v221_v25 }
 0x25a   :  { %v223_v27 = vpop.xlane.xlu0 %222 }
 0x25b   :  { %v226_v28 = vadd.f32 %v225_v26, %v223_v27 }
 0x25d   :  { %v294_v29 = vmul.f32 -1.442695, %v226_v28 }
 0x25f   :  { %348 = vpow2.f32 %v294_v29 }
 0x269   :  { %v349_v30 = vpop.eup %348 }
 0x26a   :  { %v230_v31 = vadd.f32 1.0, %v349_v30 }
 0x26c   :  { %350 = vrcp.f32 %v230_v31 }
 0x276   :  { %v351_v32 = vpop.eup %350 }
 0x277   :  { %352 = vlog2.f32 %v351_v32  ;;  %v239_v33 = vsub.f32 0.0, %v351_v32  ;;  %234 = vst.msk [vmem:[%s495_s6] sm:$0xff] %vm233_vm2, %v351_v32 }
 0x279   :  { %v240_v34 = vadd.f32 1.0, %v239_v33  ;;  %v243_v35 = vmul.f32 -0.5, %v239_v33  ;;  %v246_v39 = vand.u32 2147483647, %v239_v33 }
 0x27b   :  { %354 = vlog2.f32 %v240_v34  ;;  %v244_v37 = vadd.f32 1.0, %v243_v35  ;;  %vm247_vm3 = vcmp.lt.f32.partialorder %v246_v39, 0.0004427343 }
 0x27d   :  { %v245_v43 = vmul.f32 %v244_v37, %v239_v33 }
 0x281   :  { %v353_v36 = vpop.eup %352 }
 0x282   :  { %v237_v38 = vmul.f32 0.6931472, %v353_v36 }
 0x284   :  { %v238_v44 = vmax.f32 %v237_v38, -100.0 }
 0x285   :  { %v355_v40 = vpop.eup %354 }
 0x286   :  { %v242_v42 = vmul.f32 0.6931472, %v355_v40  ;;  %v250_v48 = vmul.f32 %v238_v44, %v235_v41 }
 0x288   :  { %v248_v46 = vsel %vm247_vm3, %v245_v43, %v242_v42 }
 0x289   :  { %v249_v47 = vmax.f32 %v248_v46, -100.0 }
 0x28b   :  { %v252_v49 = vmul.f32 %v251_v45, %v249_v47 }
 0x28d   :  { %v253_v50 = vadd.f32 %v252_v49, %v250_v48 }
 0x28f   :  { %v254_v51 = vsub.f32 0.0, %v253_v50 }
 0x291   :  { %v255_v52 = vsel %vm233_vm2, %v254_v51, 0.0 }
 0x292   :  { %256 = vadd.xlane.f32.xlu0 %v255_v52 }
 0x31f   :  { %v257_v53 = vpop.xlane.xlu0 %256 }
 0x320   :  { %v258_v54 = vrot.slane %v257_v53, 4 }
 0x322   :  { %v259_v55 = vadd.f32 %v258_v54, %v257_v53 }
 0x324   :  { %v260_v56 = vrot.slane %v259_v55, 2 }
 0x326   :  { %v261_v57 = vadd.f32 %v260_v56, %v259_v55 }
 0x328   :  { %v262_v58 = vrot.slane %v261_v57, 1 }
 0x32a   :  { %v263_v59 = vadd.f32 %v262_v58, %v261_v57 }
 0x32c   :  { %339 = vpush %v263_v59 }
 0x35d   :  { %s340_s5 = spop %339 }
 0x35e   :  { %s267_s6 = smul.f32 0.125, %s340_s5 }
 0x360   :  { %269 = sst [smem:[#allocation6]] %s267_s6 }
 0x361   :  { %387 = shalt.err (!%p384_p10)
}
 0x362   :  { %s398_s8 = smov [#allocation6]  }
 0x363   :  { %279 = dma.smem_to_hbm %s398_s8, 16, %s496_s7, [#allocation5]  }
 0x364   :  { %390 = dma.done.wait [#allocation5], 16  }
 0x365   :  { %391 = vsyncadd [#allocation5], 4294967280 }
 0x366   :  { %285 = sfence }
 0x367   :  { %286 = vsyncpa [#allocation4], 1 }
 0x368   :  { %287 = vsyncpa [#allocation5], 1 }

</bundles_post_ra>
